<compile_context>
chip_gen: v7x
topology: tpu7x:2x2x1
jax: 0.10.0
libtpu: 0.0.40
codegen_flags: <defaults>
</compile_context>

<pallas_src>
import jax
import jax.numpy as jnp
from jax.experimental import pallas as pl
from jax.experimental.pallas import tpu as pltpu

_LANE = 128


def _noise_injection_kernel(w_ref, img_ref, noise_ref, out_ref):
    # w_ref: (1,) float32 scalar in SMEM.
    # img_ref / out_ref: (1, cb, hw_block) VMEM tiles.
    # noise_ref: (1, 1, hw_block) -> broadcasts over the channel (sublane) axis.
    out_ref[...] = (img_ref[...] + w_ref[0] * noise_ref[...]).astype(out_ref.dtype)


def _vmem_pipeline_budget_bytes():
    """Per-generation budget for the double-buffered pipeline working set.

    Stays under the default scoped-VMEM limit: 16 MiB on v5e, 32 MiB on
    v6e / v7x (v7x also has only 64 MiB physical VMEM per core, so do not
    raise this toward v6e's 128 MiB physical).
    """
    try:
        kind = jax.devices()[0].device_kind.lower()
    except Exception:
        kind = ""
    if "v6" in kind or "v7" in kind:
        return 26 * 1024 * 1024  # ~6 MiB image blocks, < 32 MiB scoped default
    return 13 * 1024 * 1024      # v5e / unknown: < 16 MiB scoped default


def _pick_blocks(C, HW, itemsize, budget_bytes):
    """Pick (channel_block, spatial_block) for a (1, cb, hw) VMEM tile.

    Guarantees the double-buffered footprint 2*(2*cb + 1)*hw*itemsize fits
    `budget_bytes` (down to the minimum legal tile), so no (C, HW) combination
    can blow the scoped-VMEM limit.
    """
    hw_full = pl.cdiv(HW, _LANE) * _LANE  # last block may overhang; Pallas masks it

    # Channel blocks that keep the (sublane, lane) block tile legal.
    legal = [c for c in range(1, C + 1) if C % c == 0 and (c % 8 == 0 or c == C)]
    cb_min = min(legal)

    def footprint(cb, hw):
        # image-in + out blocks of (cb, hw) plus a (1, hw) noise block,
        # each double-buffered by the pipeline.
        return 2 * (2 * cb + 1) * hw * itemsize

    # Spatial block: as much of HW as the budget allows for cb_min channels.
    hw_budget = budget_bytes // (2 * (2 * cb_min + 1) * itemsize)
    hw_block = min(hw_full, max(_LANE, hw_budget // _LANE * _LANE))

    # Fuse as many channels as still fit, preferring sublane-packed counts for
    # the dtype (8 for 32-bit, 16 for bf16, 32 for int8/fp8).
    pack = max(8, 32 // itemsize)
    preferred = [c for c in legal
                 if (c % pack == 0 or c == C) and footprint(c, hw_block) <= budget_bytes]
    fallback = [c for c in legal if footprint(c, hw_block) <= budget_bytes]
    cb = max(preferred or fallback or [cb_min])
    return cb, hw_block


def noise_injection(image, weight, noise=None, *, key=None, donate_image=False,
                    block_budget_bytes=None):
    """Pallas implementation of NoiseInjection.forward.

    image : (B, C, H, W)
    weight: scalar / (1,) learnable parameter (kept in float32, like PyTorch)
    noise : (B, 1, H, W) or None (drawn ~ N(0,1) if None)
    """
    B, C, H, W = image.shape
    if noise is None:
        # TODO(synk): generate the noise in-kernel (pltpu.prng_seed +
        # pltpu.prng_random_bits seeded per (batch, spatial) block, cached in
        # VMEM scratch across channel steps) so it is never materialized in HBM.
        key = jax.random.PRNGKey(0) if key is None else key
        noise = jax.random.normal(key, (B, 1, H, W), dtype=image.dtype)
    assert noise.shape == (B, 1, H, W), noise.shape
    weight = jnp.asarray(weight, dtype=jnp.float32).reshape((1,))

    HW = H * W
    itemsize = jnp.dtype(image.dtype).itemsize
    budget = _vmem_pipeline_budget_bytes() if block_budget_bytes is None else block_budget_bytes
    cb, hw_block = _pick_blocks(C, HW, itemsize, budget)
    n_s = pl.cdiv(HW, hw_block)
    n_c = C // cb

    # Free reshapes (collapse / split of trailing contiguous dims).
    img2 = image.reshape(B, C, HW)
    noi2 = noise.reshape(B, 1, HW)

    out = pl.pallas_call(
        _noise_injection_kernel,
        out_shape=jax.ShapeDtypeStruct((B, C, HW), image.dtype),
        # Channel axis innermost: the noise block index (b, 0, s) is constant
        # across consecutive steps, so its DMA happens once per (b, s).
        grid=(B, n_s, n_c),
        in_specs=[
            pl.BlockSpec(memory_space=pltpu.MemorySpace.SMEM),           # weight
            pl.BlockSpec((1, cb, hw_block), lambda b, s, c: (b, c, s)),  # image
            pl.BlockSpec((1, 1, hw_block), lambda b, s, c: (b, 0, s)),   # noise
        ],
        out_specs=pl.BlockSpec((1, cb, hw_block), lambda b, s, c: (b, c, s)),
        compiler_params=pltpu.CompilerParams(
            dimension_semantics=("parallel", "parallel", "parallel")),
        # Optionally reuse the image HBM buffer for the output when the caller
        # donates it (d(out)/d(image) = I, so image is not a VJP residual).
        input_output_aliases=({1: 0} if donate_image else {}),
    )(weight, img2, noi2)

    return out.reshape(B, C, H, W)


def _check(image, noise, weight, **kwargs):
    out = jax.block_until_ready(noise_injection(image, weight, noise, **kwargs))
    w = jnp.asarray(weight, jnp.float32).reshape(())
    ref = (image.astype(jnp.float32) + w * noise.astype(jnp.float32)).astype(image.dtype)
    assert out.shape == image.shape and out.dtype == image.dtype
    tol = 1e-6 if image.dtype == jnp.float32 else 1e-2
    assert jnp.allclose(out.astype(jnp.float32), ref.astype(jnp.float32),
                        atol=tol, rtol=tol), "mismatch vs reference"
    return out


if __name__ == "__main__":
    key = jax.random.PRNGKey(0)
    keys = jax.random.split(key, 8)

    # nn.Parameter(torch.zeros(1)) is zero-init; use a nonzero deterministic
    # value so the scaled-noise path is actually exercised.
    weight = jnp.array([0.5], dtype=jnp.float32)

    # Case 1: shapes implied by the module (H*W already a 128-lane multiple).
    B, C, H, W = 2, 4, 16, 16
    image = jax.random.normal(keys[0], (B, C, H, W), dtype=jnp.float32)
    noise = jax.random.normal(keys[1], (B, 1, H, W), dtype=jnp.float32)
    _check(image, noise, weight)

    # Case 2: H*W not a multiple of 128 (ragged last block with masked stores,
    # no host-side pad/slice) and C > 8 (multi-channel fused blocks).
    B, C, H, W = 2, 16, 10, 12
    image = jax.random.normal(keys[2], (B, C, H, W), dtype=jnp.float32)
    noise = jax.random.normal(keys[3], (B, 1, H, W), dtype=jnp.float32)
    _check(image, noise, weight)

    # Case 3: tiny explicit block budget to force spatial + channel tiling
    # (exercises the channel-innermost grid / noise reuse / footprint sizing).
    B, C, H, W = 2, 16, 16, 24
    image = jax.random.normal(keys[4], (B, C, H, W), dtype=jnp.float32)
    noise = jax.random.normal(keys[5], (B, 1, H, W), dtype=jnp.float32)
    _check(image, noise, weight, block_budget_bytes=8 * 1024)

    # Case 4: bf16 path (dtype-aware sublane packing: cb becomes a multiple of 16).
    B, C, H, W = 2, 16, 16, 16
    image = jax.random.normal(keys[6], (B, C, H, W), dtype=jnp.bfloat16)
    noise = jax.random.normal(keys[7], (B, 1, H, W), dtype=jnp.bfloat16)
    _check(image, noise, weight)

    print("KERNEL_OK")
</pallas_src>

<mosaic_0001>
module attributes {stable_mosaic.version = 11 : i64} {
  func.func @_noise_injection_kernel(%arg0: i32, %arg1: i32, %arg2: i32, %arg3: memref<1xf32, #tpu.memory_space<smem>>, %arg4: memref<1x4x256xf32, #tpu.memory_space<vmem>>, %arg5: memref<1x1x256xf32, #tpu.memory_space<vmem>>, %arg6: memref<1x4x256xf32, #tpu.memory_space<vmem>>) attributes {dimension_semantics = [#tpu.dimension_semantics<parallel>, #tpu.dimension_semantics<parallel>, #tpu.dimension_semantics<parallel>], iteration_bounds = array<i64: 2, 1, 1>, scalar_prefetch = 0 : i64, scratch_operands = 0 : i64, tpu.core_type = #tpu.core_type<tc>, window_params = [{transform_indices = @transform_0, window_bounds = array<i64: 1>}, {transform_indices = @transform_1, window_bounds = array<i64: 1, 4, 256>}, {transform_indices = @transform_2, window_bounds = array<i64: 1, 1, 256>}, {transform_indices = @transform_3, window_bounds = array<i64: 1, 4, 256>}]} {
    %c0 = arith.constant 0 : index
    %c0_0 = arith.constant 0 : index
    %c0_1 = arith.constant 0 : index
    %0 = vector.load %arg4[%c0, %c0_0, %c0_1] : memref<1x4x256xf32, #tpu.memory_space<vmem>>, vector<1x4x256xf32>
    %c0_2 = arith.constant 0 : index
    %1 = memref.load %arg3[%c0_2] : memref<1xf32, #tpu.memory_space<smem>>
    %c0_3 = arith.constant 0 : index
    %c0_4 = arith.constant 0 : index
    %c0_5 = arith.constant 0 : index
    %2 = vector.load %arg5[%c0_3, %c0_4, %c0_5] : memref<1x1x256xf32, #tpu.memory_space<vmem>>, vector<1x1x256xf32>
    %3 = vector.broadcast %1 : f32 to vector<1x1x256xf32>
    %4 = arith.mulf %3, %2 : vector<1x1x256xf32>
    %5 = vector.broadcast %4 : vector<1x1x256xf32> to vector<1x4x256xf32>
    %6 = arith.addf %0, %5 : vector<1x4x256xf32>
    %c0_6 = arith.constant 0 : index
    %c0_7 = arith.constant 0 : index
    %c0_8 = arith.constant 0 : index
    %7 = vector.load %arg6[%c0_6, %c0_7, %c0_8] : memref<1x4x256xf32, #tpu.memory_space<vmem>>, vector<1x4x256xf32>
    tpu.vector_store %arg6[%c0_6, %c0_7, %c0_8], %6 {strides = array<i32>} : memref<1x4x256xf32, #tpu.memory_space<vmem>>, vector<1x4x256xf32>,
    return
  }
  func.func @transform_0(%arg0: i32, %arg1: i32, %arg2: i32) -> i32 {
    %c0_i32 = arith.constant 0 : i32
    %c0_i32_0 = arith.constant 0 : i32
    return %c0_i32 : i32
  }
  func.func @transform_1(%arg0: i32, %arg1: i32, %arg2: i32) -> (i32, i32, i32) {
    %c0_i32 = arith.constant 0 : i32
    return %arg0, %arg2, %arg1 : i32, i32, i32
  }
  func.func @transform_2(%arg0: i32, %arg1: i32, %arg2: i32) -> (i32, i32, i32) {
    %c0_i32 = arith.constant 0 : i32
    %c0_i32_0 = arith.constant 0 : i32
    return %arg0, %c0_i32, %arg1 : i32, i32, i32
  }
  func.func @transform_3(%arg0: i32, %arg1: i32, %arg2: i32) -> (i32, i32, i32) {
    %c0_i32 = arith.constant 0 : i32
    return %arg0, %arg2, %arg1 : i32, i32, i32
  }
}

</mosaic_0001>

<bundles_post_ra>
// kernel: tpu_custom_call.1
= control target key start
LH: loop header
LB: loop body
LE: loop exit
PB: predicated region body
PF: predicated region fallthrough
CT: control target
= control target key end

     0   :  { %s793_s0 = inlined_call_operand.<no memory space> [shape: f32[1], index: 0, kind: input, shape index: {}]   ;;  %s794_s1 = inlined_call_operand.hbm [shape: f32[2,4,256], index: 1, kind: input, shape index: {}]   ;;  %s795_s2 = inlined_call_operand.vmem [shape: f32[2,1,256], index: 2, kind: input, shape index: {}]   ;;  %s796_s3 = inlined_call_operand.hbm [shape: f32[2,4,256], index: 3, kind: output, shape index: {}]  }
   0x1   :  { %8 = sst [smem:[#allocation2]] %s793_s0 }
   0x2   :  { %9 = vsyncpa [#allocation4], 0 }
   0x3   :  { %11 = vsyncpa [#allocation4 + $0x1], 0 }
   0x4   :  { %12 = vsyncpa [#allocation5], 0 }
   0x5   :  { %14 = vsyncpa [#allocation5 + $0x1], 0  ;;  %s616_s14 = smov 0   ;;  %s618_s15 = smov 0  }
   0x6   :  { %s620_s16 = smov 0   ;;  %s622_s17 = smov 0  }
   0x7   :  { %s624_s18 = smov 0   ;;  %s626_s19 = smov 0  }
   0x8 LB: > { %s397_s0 = sadd.s32 4294967295, %s589_s19   ;;  %s398_s20 = sadd.s32 4294967294, %s589_s19   ;;  %s589_s19 = sphi %s626_s19, %s20_s19   ;;  %s585_s18 = sphi %s624_s18, %s812_s18   ;;  %s581_s17 = sphi %s622_s17, %s811_s17   ;;  %s577_s16 = sphi %s620_s16, %s810_s16   ;;  %s573_s15 = sphi %s618_s15, %s809_s15   ;;  %s569_s14 = sphi %s616_s14, %s808_s14  }
   0x9   : > { %s39_s21 = sadd.s32 1, %s585_s18  ;;  %s71_s22 = sadd.s32 1, %s577_s16 }
   0xa   : > { %p41_p0 = scmp.ge.s32.totalorder %s39_s21, 2  ;;  %p78_p1 = scmp.ne.s32.totalorder %s577_s16, %s573_s15 }
   0xb   : > { %p79_p2 = scmp.eq.s32.totalorder %s589_s19, 0  ;;  %p84_p3 = scmp.ne.s32.totalorder %s573_s15, %s569_s14 }
   0xc   : > { %s814_s21 = smov (%p41_p0, %s39_s21), 0  ;;  %p85_p5 = scmp.eq.s32.totalorder %s397_s0, 0 }
   0xd   : > { %p657_p4 = por %p79_p2, %p78_p1  ;;  %s64_s24 = ssub.s32 %s585_s18, %s814_s21 }
   0xe   : > { %p140_p6 = scmp.eq.s32.totalorder %s397_s0, 1  ;;  %p69_p7 = scmp.eq.s32.totalorder %s64_s24, 0 }
   0xf   : > { %p663_p8 = por %p85_p5, %p84_p3  ;;  %p146_p10 = scmp.eq.s32.totalorder %s398_s20, 1 }
  0x10   : > { %p667_p9 = por %p140_p6, %p78_p1  ;;  %p427_p13 = scmp.lt.s32.totalorder %s589_s19, 2 }
  0x11   : > { %s672_s27 = scalar_select %p69_p7, %s577_s16, %s71_s22  }
  0x12   : > { %s800_s26 = scalar_select %p667_p9, 1, 0 }
  0x13   : > { %p674_p11 = por %p146_p10, %p84_p3  ;;  %s169_s29 = sand.u32 1, %s577_s16  }
  0x14   : > { %s401_s30 = sshll.u32 %s169_s29, 3  ;;  %s413_s4 = sshll.u32 %s585_s18, 7 }
  0x15   : > { %s801_s28 = scalar_select %p674_p11, 1, 0 }
  0x16   : > { %s685_s7 = scalar_lea.hbm %s794_s1, %s413_s4  ;;  %s173_s8 = scalar_lea.vmem [#allocation3], %s401_s30 }
  0x17   : > { %s185_s9 = sshll.u32 %s173_s8, 4  ;;  %p691_p0 = pnand %p427_p13, %p657_p4  ;;  %s687_s9 = int_to_ptr.vmem [resolvable:$true] %s185_s9 }
  0x18   : > { %s170_s11 = scalar_lea.sflag [#allocation4], %s169_s29  ;;  %s477_s12 = scalar_lea.hbm %s685_s7, 128 }
  0x19   : > { %p478_p3 = scmp.ne.s32.totalorder %s685_s7, %s477_s12  ;;  %p479_p5 = pneg %p691_p0 }
  0x1a   : > { %s482_s20 = scalar_lea.hbm %s794_s1, 256  ;;  %p483_p4 = scmp.lt.u32.totalorder %s685_s7, %s794_s1 }
  0x1b   : > { %p480_p6 = pnand %p479_p5, %p478_p3  ;;  %p484_p10 = scmp.lt.u32.totalorder %s482_s20, %s477_s12 }
  0x1c   : > { %p486_p12 = scmp.lt.u32.totalorder %s477_s12, %s685_s7 }
  0x1d   : > { %p481_p7 = pneg %p480_p6  ;;  %p485_p13 = por %p484_p10, %p483_p4 }
  0x1f   : > { %p487_p1 = por %p486_p12, %p485_p13 }
  0x21   : > { %p488_p2 = pnand %p487_p1, %p481_p7 }
  0x23   : > { %491 = shalt.err (!%p488_p2)
}
  0x24   : > { %s492_s24 = scalar_lea.vmem %s687_s9, 128  ;;  %s591_s29 = smov [#allocation3]  }
  0x25   : > { %p493_p3 = scmp.ne.s32.totalorder %s687_s9, %s492_s24  ;;  %s497_s30 = sshll.u32 %s591_s29, 4  ;;  %s498_s30 = int_to_ptr.vmem [resolvable:$false] %s497_s30 }
  0x26   : > { %s499_s4 = scalar_lea.vmem %s498_s30, 256  ;;  %p500_p9 = scmp.lt.s32.totalorder %s687_s9, %s498_s30 }
  0x27   : > { %p495_p6 = pnand %p493_p3, %p479_p5  ;;  %p501_p4 = scmp.lt.s32.totalorder %s499_s4, %s492_s24 }
  0x29   : > { %p496_p11 = pneg %p495_p6  ;;  %p502_p10 = por %p501_p4, %p500_p9 }
  0x2b   : > { %p503_p12 = pnand %p502_p10, %p496_p11 }
  0x2d   : > { %506 = shalt.err (!%p503_p12)
}
  0x2e   : > { %422 = dma.hbm_to_vmem [thread:$0]  (!%p691_p0), %s685_s7, 128, %s687_s9, %s170_s11  }
  0x2f   : > { %p803_p1 = scmp.lt.s32.totalorder %s589_s19, 3  ;;  %p804_p2 = scmp.ge.s32.totalorder %s589_s19, 1 }
  0x31   : > { %p203_p5 = pnand %p804_p2, %p803_p1 }
  0x32   : > { %s727_s5 = sand.u32 (!%p203_p5), 1, %s573_s15  }
  0x33   : > { %206 = sbr.rel (%p203_p5) target bundleno = 88 (0x58), region = 32  ;;  %s405_s6 = sshll.u32 (!%p203_p5), %s727_s5, 3 }
  0x34   : > { %s209_s8 = scalar_lea.sflag (!%p203_p5), [#allocation4], %s727_s5  ;;  %s212_s12 = scalar_lea.vmem (!%p203_p5), [#allocation3], %s405_s6 }
  0x3a   : > { %560 = dma.done.wait (%p663_p8), %s209_s8, 128  }
  0x3b   : > { %562 = vsyncadd (%p663_p8), %s209_s8, 4294967168  ;;  %p245_p9 = scmp.lt.s32.totalorder %s581_s17, 1  ;;  %v260_v0 = vlaneseq  ;;  %s255_s7 = sld [smem:[#allocation2]]  ;;  %v254_v9 = vld [vmem:[%s212_s12] sm:$0xff] }
  0x3c   : > { %s242_s25 = scalar_lea.vmem [#allocation6], %s405_s6  ;;  %s414_s22 = sshll.u32 %s581_s17, 7 }
  0x3d   : > { %s246_s9 = scalar_select %p245_p9, %s581_s17, 1  ;;  %v261_v1 = vshrl.u32 %v260_v0, 7 }
  0x3e   : > { %s291_s20 = sshll.u32 %s242_s25, 4  ;;  %s746_s29 = scalar_lea.hbm %s796_s3, %s414_s22  ;;  %s741_s20 = int_to_ptr.vmem [resolvable:$true] %s291_s20 }
  0x3f   : > { %s407_s10 = sshll.u32 %s246_s9, 1  ;;  %v262_v2 = vsub.s32 0, %v261_v1  ;;  %v266_v3 = vsub.s32 1, %v261_v1  ;;  %s273_s30 = scalar_lea.sflag [#allocation5], %s727_s5 }
  0x40   : > { %s251_s0 = scalar_lea.vmem %s795_s2, %s407_s10  ;;  %s507_s4 = scalar_lea.vmem %s741_s20, 128 }
  0x41   : > { %v256_v4 = vld [vmem:[%s251_s0] sm:$0x3]  ;;  %v257_v5 = vstv %s255_s7  ;;  %p508_p8 = scmp.ne.s32.totalorder %s741_s20, %s507_s4  ;;  %p805_p11 = scmp.ne.s32.totalorder %s800_s26, 0 }
  0x42   : > { %v258_v6 = vmul.f32 %v257_v5, %v256_v4  ;;  %s592_s17 = smov [#allocation6]  }
  0x43   : > { %p509_p0 = pnand %p508_p8, %p805_p11  ;;  %s511_s6 = sshll.u32 %s592_s17, 4  ;;  %s512_s6 = int_to_ptr.vmem [resolvable:$false] %s511_s6 }
  0x44   : > { %v263_v7 = vrot.slane %v258_v6, %v262_v2  ;;  %v267_v8 = vrot.slane %v258_v6, %v266_v3  ;;  %s513_s8 = scalar_lea.vmem %s512_s6, 256  ;;  %p514_p13 = scmp.lt.s32.totalorder %s741_s20, %s512_s6 }
  0x45   : > { %p510_p7 = pneg %p509_p0  ;;  %p515_p3 = scmp.lt.s32.totalorder %s513_s8, %s507_s4 }
  0x46   : > { %v268_v10 = vcombine.low %v263_v7, %v267_v8 }
  0x47   : > { %p516_p6 = por %p515_p3, %p514_p13 }
  0x48   : > { %v270_v11 = vadd.f32 %v268_v10, %v254_v9 }
  0x49   : > { %p517_p4 = pnand %p516_p6, %p510_p7 }
  0x4a   : > { %271 = vst [vmem:[%s242_s25] sm:$0xff] %v270_v11 }
  0x4b   : > { %520 = shalt.err (!%p517_p4)
}
  0x4c   : > { %s521_s5 = scalar_lea.hbm %s746_s29, 128  ;;  %s525_s9 = scalar_lea.hbm %s796_s3, 256 }
  0x4d   : > { %p522_p10 = scmp.ne.s32.totalorder %s746_s29, %s521_s5  ;;  %p526_p2 = scmp.lt.u32.totalorder %s746_s29, %s796_s3 }
  0x4e   : > { %p527_p5 = scmp.lt.u32.totalorder %s525_s9, %s521_s5  ;;  %p529_p8 = scmp.lt.u32.totalorder %s521_s5, %s746_s29 }
  0x4f   : > { %p523_p12 = pnand %p522_p10, %p805_p11 }
  0x50   : > { %p528_p9 = por %p527_p5, %p526_p2 }
  0x51   : > { %p524_p1 = pneg %p523_p12 }
  0x52   : > { %p530_p0 = por %p529_p8, %p528_p9 }
  0x54   : > { %p531_p7 = pnand %p530_p0, %p524_p1 }
  0x56   : > { %534 = shalt.err (!%p531_p7)
}
  0x57   : > { %417 = dma.vmem_to_hbm [thread:$0]  (%p805_p11), %s741_s20, 128, %s746_s29, %s273_s30  }
  0x58 PF: > { %s303_s13 = sand.u32 1, %s569_s14   ;;  %p806_p13 = scmp.ne.s32.totalorder %s801_s28, 0 }
  0x59   : > { %p807_p3 = scmp.ge.s32.totalorder %s589_s19, 2  ;;  %s304_s0 = scalar_lea.sflag [#allocation5], %s303_s13 }
  0x5b   : > { %p424_p6 = pnand %p807_p3, %p806_p13 }
  0x5d   : > { %564 = dma.done.wait (!%p424_p6), %s304_s0, 128  }
  0x5e   : > { %566 = vsyncadd (!%p424_p6), %s304_s0, 4294967168  ;;  %s20_s19 = sadd.s32 1, %s589_s19   ;;  %s808_s14 = smov %s573_s15 }
  0x5f   : > { %p17_p4 = scmp.ge.s32.totalorder %s20_s19, 4   ;;  %s809_s15 = smov %s577_s16 }
  0x60   : > { %s810_s16 = smov %s672_s27  ;;  %s811_s17 = smov %s585_s18 }
  0x61   : > { %s812_s18 = smov %s814_s21  ;;  %19 = sbr.rel (!%p17_p4) target bundleno = 8 (0x8), region = 80 }
  0x68   :  { %309 = vsyncpa [#allocation4], 1 }
  0x69   :  { %311 = vsyncpa [#allocation4 + $0x1], 1 }
  0x6a   :  { %312 = vsyncpa [#allocation5], 1 }
  0x6b   :  { %314 = vsyncpa [#allocation5 + $0x1], 1 }

</bundles_post_ra>
